<compile_context>
chip_gen: v5e
topology: v5e:2x2
jax: 0.10.0
libtpu: 0.0.40
codegen_flags: <defaults>
</compile_context>

<pallas_src>
import jax
import jax.numpy as jnp
from jax import lax
from jax.experimental import pallas as pl
from jax.experimental.pallas import tpu as pltpu


# ----------------------------------------------------------------------------
# Plain-JAX glue: sampling & grouping (data-dependent gathers / sort)
# ----------------------------------------------------------------------------
def square_distance(src, dst):
    # src: [B, N, C], dst: [B, M, C] -> [B, N, M]
    dist = -2.0 * jnp.einsum("bnc,bmc->bnm", src, dst)
    dist = dist + jnp.sum(src ** 2, -1)[:, :, None]
    dist = dist + jnp.sum(dst ** 2, -1)[:, None, :]
    return dist


def farthest_point_sample(xyz, npoint, key):
    # xyz: [B, N, 3] -> centroids: [B, npoint] int32
    B, N, _ = xyz.shape
    distance = jnp.full((B, N), 1e10, dtype=jnp.float32)
    farthest = jax.random.randint(key, (B,), 0, N, dtype=jnp.int32)
    centroids = jnp.zeros((B, npoint), dtype=jnp.int32)

    def body(i, carry):
        centroids, distance, farthest = carry
        centroids = centroids.at[:, i].set(farthest)
        centroid = jnp.take_along_axis(xyz, farthest[:, None, None], axis=1)  # [B,1,3]
        dist = jnp.sum((xyz - centroid) ** 2, -1)  # [B, N]
        distance = jnp.minimum(distance, dist)
        farthest = jnp.argmax(distance, axis=-1).astype(jnp.int32)
        return centroids, distance, farthest

    centroids, _, _ = lax.fori_loop(0, npoint, body, (centroids, distance, farthest))
    return centroids


def index_points(points, idx):
    # points: [B, N, C], idx: [B, ...] -> [B, ..., C]
    return jax.vmap(lambda p, i: p[i])(points, idx)


def query_ball_point(radius, nsample, xyz, new_xyz):
    # xyz: [B, N, 3], new_xyz: [B, S, 3] -> [B, S, nsample] int32
    B, N, _ = xyz.shape
    _, S, _ = new_xyz.shape
    group_idx = jnp.broadcast_to(jnp.arange(N, dtype=jnp.int32)[None, None, :], (B, S, N))
    sqrdists = square_distance(new_xyz, xyz)
    group_idx = jnp.where(sqrdists > radius ** 2, N, group_idx)
    group_idx = jnp.sort(group_idx, axis=-1)[:, :, :nsample]
    group_first = jnp.broadcast_to(group_idx[:, :, :1], (B, S, nsample))
    group_idx = jnp.where(group_idx == N, group_first, group_idx)
    return group_idx


def sample_and_group(npoint, radius, nsample, xyz, points, key):
    # xyz: [B, N, 3], points: [B, N, D] or None
    B, N, C = xyz.shape
    S = npoint
    fps_idx = farthest_point_sample(xyz, npoint, key)          # [B, S]
    new_xyz = index_points(xyz, fps_idx)                       # [B, S, 3]
    idx = query_ball_point(radius, nsample, xyz, new_xyz)      # [B, S, nsample]
    grouped_xyz = index_points(xyz, idx)                       # [B, S, nsample, 3]
    grouped_xyz_norm = grouped_xyz - new_xyz[:, :, None, :]
    if points is not None:
        grouped_points = index_points(points, idx)             # [B, S, nsample, D]
        new_points = jnp.concatenate([grouped_xyz_norm, grouped_points], axis=-1)
    else:
        new_points = grouped_xyz_norm
    return new_xyz, new_points


def sample_and_group_all(xyz, points):
    B, N, C = xyz.shape
    new_xyz = jnp.zeros((B, 1, C), dtype=xyz.dtype)
    grouped_xyz = xyz.reshape(B, 1, N, C)
    if points is not None:
        new_points = jnp.concatenate(
            [grouped_xyz, points.reshape(B, 1, N, -1)], axis=-1)
    else:
        new_points = grouped_xyz
    return new_xyz, new_points


# ----------------------------------------------------------------------------
# Pallas kernel: fused (1x1 conv -> BN(eval) -> ReLU)* -> max over K
# ----------------------------------------------------------------------------
def _round_up(x, m):
    return ((x + m - 1) // m) * m


def _make_mlp_kernel(num_layers, nsample, ts):
    def kernel(x_ref, *args):
        # x_ref: [1, 1, Cin_pad, K*TS] bf16 (k-major, point-minor on lanes)
        w_refs = args[:num_layers]                 # each [Cout_pad, Cin_pad] bf16
        b_refs = args[num_layers:2 * num_layers]   # each [Cout_pad, 1] f32
        out_ref = args[2 * num_layers]             # [1, C_pad, TS] f32

        h = x_ref[0, 0]                            # [Cin_pad, K*TS]
        for li in range(num_layers):
            # Load weights/biases inside the layer loop (no entry hoist) so they
            # don't stay live across the whole body at production channel sizes.
            w = w_refs[li][...]
            b = b_refs[li][...]
            # One MXU matmul per layer over all K*TS points (bf16 in, f32 acc).
            h = jnp.dot(w, h.astype(jnp.bfloat16),
                        preferred_element_type=jnp.float32)    # [Cout_pad, K*TS]
            h = jnp.maximum(h + b, 0.0)            # bias + ReLU in f32 (VPU)

        if ts == 1:
            # group_all path (S == 1): global max over all lanes, one XLU reduce.
            acc = jnp.max(h, axis=-1, keepdims=True)
        else:
            # Max over K as K static, lane-aligned slice comparisons (VPU).
            acc = h[:, 0:ts]
            for k in range(1, nsample):
                acc = jnp.maximum(acc, h[:, k * ts:(k + 1) * ts])
        out_ref[0] = acc
    return kernel


def _vmem_limits():
    """Generation-aware VMEM limit (for Mosaic) and tile budget (for _choose_ts)."""
    cap = None
    try:
        cap = getattr(pltpu.get_tpu_info(), "vmem_capacity_bytes", None)
    except Exception:
        cap = None
    if not cap:
        cap = 64 * 1024 * 1024                   # conservative (v7x per-TensorCore)
    limit = min((cap * 3) // 4, 100 * 1024 * 1024)   # 96 MiB on v5e/v6e, 48 MiB on v7x
    budget = (limit * 7) // 10
    return int(limit), int(budget)


def _choose_ts(S, K, cin_pad, c_pad, max_cout, w_bytes, budget_bytes):
    """Largest divisor of S that is a multiple of 128 (or S itself) fitting VMEM."""
    divs = [d for d in range(1, S + 1) if S % d == 0]
    cands = [d for d in divs if d % 128 == 0 or d == S]

    def bytes_needed(ts):
        lanes = _round_up(K * ts, 128)           # lane padding of the folded axis
        out_lanes = _round_up(ts, 128)
        return (2 * cin_pad * lanes * 2          # input block, bf16, double-buffered
                + 2 * c_pad * out_lanes * 4      # output block, f32, double-buffered
                + 2 * max_cout * lanes * 4       # two live f32 layer intermediates
                + c_pad * out_lanes * 4          # running-max accumulator
                + 2 * w_bytes)                   # weights/biases (double-buffered)

    fitting = [d for d in cands if bytes_needed(d) <= budget_bytes]
    if fitting:
        return max(fitting)
    return min(cands)    # smallest legal tile; compiler gets the final say on VMEM


def mlp_maxpool_pallas(grouped, weights, biases):
    """grouped: [B, S, K, Cin_pad] bf16.  Returns [B, C_pad, S] f32 ( = [B, C, S])."""
    B, S, K, cin_pad = grouped.shape
    num_layers = len(weights)
    c_pad = weights[-1].shape[0]
    max_cout = max(w.shape[0] for w in weights)
    w_bytes = (sum(w.size * w.dtype.itemsize for w in weights)
               + sum(b.size * b.dtype.itemsize for b in biases))

    vmem_limit, vmem_budget = _vmem_limits()
    ts = _choose_ts(S, K, cin_pad, c_pad, max_cout, w_bytes, vmem_budget)
    n_s = S // ts

    # Wrapper-side relayout to the lane-dense, k-major kernel layout so the
    # kernel never reshapes: [B, S, K, C] -> [B, n_s, Cin_pad, K*TS].
    x = grouped.reshape(B, n_s, ts, K, cin_pad)
    x = jnp.transpose(x, (0, 1, 4, 3, 2))              # [B, n_s, C, K, TS]
    x = x.reshape(B, n_s, cin_pad, K * ts)

    in_specs = [pl.BlockSpec((1, 1, cin_pad, K * ts), lambda b, si: (b, si, 0, 0))]
    for w in weights:
        in_specs.append(pl.BlockSpec(w.shape, lambda b, si: (0, 0)))
    for bias in biases:
        in_specs.append(pl.BlockSpec(bias.shape, lambda b, si: (0, 0)))
    out_spec = pl.BlockSpec((1, c_pad, ts), lambda b, si: (b, 0, si))

    # Advisory cost estimate so XLA schedules around the FPS/sort glue.
    flops = 0
    last = cin_pad
    for w in weights:
        flops += 2 * B * S * K * last * w.shape[0]
        last = w.shape[0]
    bytes_accessed = x.size * x.dtype.itemsize + w_bytes + B * S * c_pad * 4

    return pl.pallas_call(
        _make_mlp_kernel(num_layers, K, ts),
        out_shape=jax.ShapeDtypeStruct((B, c_pad, S), jnp.float32),
        grid=(B, n_s),
        in_specs=in_specs,
        out_specs=out_spec,
        compiler_params=pltpu.CompilerParams(
            dimension_semantics=("parallel", "parallel"),
            vmem_limit_bytes=vmem_limit),
        cost_estimate=pl.CostEstimate(flops=flops, transcendentals=0,
                                      bytes_accessed=bytes_accessed),
    )(x, *weights, *biases)


# ----------------------------------------------------------------------------
# Module: parameter setup + forward
# ----------------------------------------------------------------------------
class PointNetSetAbstractionPallas:
    def __init__(self, npoint, radius, nsample, in_channel, mlp, group_all, key):
        self.npoint = npoint
        self.radius = radius
        self.nsample = nsample
        self.group_all = group_all
        self.in_channel = in_channel
        self.cin_pad = _round_up(in_channel, 8)        # pad odd Cin (7 -> 8)
        self.c_last = mlp[-1]
        self.weights = []   # fused with eval-mode BN, zero-padded, bf16, [Cout_p, Cin_p]
        self.biases = []    # f32, [Cout_p, 1]
        eps = 1e-5

        last_logical = in_channel
        padded_in = self.cin_pad
        for out_channel in mlp:
            padded_out = _round_up(out_channel, 8)

            key, kw, kb = jax.random.split(key, 3)
            # Conv2d(last, out, 1): weight [Cout, Cin, 1, 1], bias [Cout]
            bound = 1.0 / (last_logical ** 0.5)
            w = jax.random.uniform(kw, (out_channel, last_logical),
                                   minval=-bound, maxval=bound, dtype=jnp.float32)
            b = jax.random.uniform(kb, (out_channel,),
                                   minval=-bound, maxval=bound, dtype=jnp.float32)
            # BatchNorm2d (eval): gamma=1, beta=0, running_mean=0, running_var=1
            gamma = jnp.ones((out_channel,), jnp.float32)
            beta = jnp.zeros((out_channel,), jnp.float32)
            run_mean = jnp.zeros((out_channel,), jnp.float32)
            run_var = jnp.ones((out_channel,), jnp.float32)
            scale = gamma / jnp.sqrt(run_var + eps)
            w_eff = w * scale[:, None]                  # [Cout, Cin]
            b_eff = (b - run_mean) * scale + beta       # [Cout]

            # Zero-pad (exact no-op: padded input channels are zero, ReLU(0)=0).
            w_full = jnp.zeros((padded_out, padded_in), jnp.float32)
            w_full = w_full.at[:out_channel, :last_logical].set(w_eff)
            b_full = jnp.zeros((padded_out, 1), jnp.float32)
            b_full = b_full.at[:out_channel, 0].set(b_eff)

            self.weights.append(w_full.astype(jnp.bfloat16))
            self.biases.append(b_full)

            last_logical = out_channel
            padded_in = padded_out
        self.c_pad = padded_in

    def group(self, xyz, points, key):
        """xyz [B,3,N], points [B,D,N]|None -> new_xyz [B,S,3], grouped [B,S,K,Cin_pad] f32."""
        xyz_t = jnp.transpose(xyz, (0, 2, 1))                        # [B, N, 3]
        points_t = None if points is None else jnp.transpose(points, (0, 2, 1))
        if self.group_all:
            new_xyz, new_points = sample_and_group_all(xyz_t, points_t)
        else:
            new_xyz, new_points = sample_and_group(
                self.npoint, self.radius, self.nsample, xyz_t, points_t, key)
        pad = self.cin_pad - new_points.shape[-1]
        if pad > 0:
            new_points = jnp.pad(new_points, ((0, 0), (0, 0), (0, 0), (0, pad)))
        return new_xyz, new_points

    def __call__(self, xyz, points, key):
        """xyz: [B, 3, N], points: [B, D, N] or None.
        Returns new_xyz [B, 3, S], new_points [B, C_last, S]."""
        new_xyz, grouped = self.group(xyz, points, key)
        # TODO(synk): fuse this gather into the kernel via scalar-prefetched idx
        #             + manual DMA so `grouped` never round-trips HBM.
        feats = mlp_maxpool_pallas(grouped.astype(jnp.bfloat16),
                                   self.weights, self.biases)        # [B, C_pad, S]
        new_points_out = feats[:, :self.c_last, :]                   # [B, C_last, S]
        new_xyz_out = jnp.transpose(new_xyz, (0, 2, 1))              # [B, 3, S]
        return new_xyz_out, new_points_out


if __name__ == "__main__":
    key = jax.random.PRNGKey(0)
    k_xyz, k_pts, k_param, k_fps = jax.random.split(key, 4)

    B, N, D = 2, 64, 4
    npoint, radius, nsample = 16, 0.4, 8
    mlp = [16, 32]
    in_channel = 3 + D

    xyz = jax.random.uniform(k_xyz, (B, 3, N), dtype=jnp.float32)     # [B, 3, N]
    points = jax.random.normal(k_pts, (B, D, N), dtype=jnp.float32)   # [B, D, N]

    sa = PointNetSetAbstractionPallas(npoint, radius, nsample, in_channel,
                                      mlp, group_all=False, key=k_param)

    new_xyz, new_feats = sa(xyz, points, k_fps)
    jax.block_until_ready((new_xyz, new_feats))

    assert new_xyz.shape == (B, 3, npoint)
    assert new_feats.shape == (B, mlp[-1], npoint)
    assert bool(jnp.all(jnp.isfinite(new_feats)))

    # Plain-JAX reference for the fused MLP + max (same grouping/key, f32 math).
    _, grouped = sa.group(xyz, points, k_fps)              # [B, S, K, Cin_pad] f32
    h = grouped.astype(jnp.float32)
    for w, b in zip(sa.weights, sa.biases):
        h = jnp.maximum(
            jnp.einsum("bskc,oc->bsko", h, w.astype(jnp.float32)) + b[:, 0], 0.0)
    ref = jnp.transpose(jnp.max(h, axis=2), (0, 2, 1))[:, :sa.c_last, :]
    err = float(jnp.max(jnp.abs(ref - new_feats)))
    assert err < 0.1, f"max abs err vs reference: {err}"

    print("KERNEL_OK")
</pallas_src>

<mosaic_0001>
module attributes {stable_mosaic.version = 11 : i64} {
  func.func @kernel(%arg0: i32, %arg1: i32, %arg2: memref<1x1x8x128xbf16, #tpu.memory_space<vmem>>, %arg3: memref<16x8xbf16, #tpu.memory_space<vmem>>, %arg4: memref<32x16xbf16, #tpu.memory_space<vmem>>, %arg5: memref<16x1xf32, #tpu.memory_space<vmem>>, %arg6: memref<32x1xf32, #tpu.memory_space<vmem>>, %arg7: memref<1x32x16xf32, #tpu.memory_space<vmem>>) attributes {dimension_semantics = [#tpu.dimension_semantics<parallel>, #tpu.dimension_semantics<parallel>], iteration_bounds = array<i64: 2, 1>, scalar_prefetch = 0 : i64, scratch_operands = 0 : i64, tpu.core_type = #tpu.core_type<tc>, window_params = [{transform_indices = @transform_0, window_bounds = array<i64: 1, 1, 8, 128>}, {pipeline_mode = #tpu.pipeline_mode<synchronous>, transform_indices = @transform_1, window_bounds = array<i64: 16, 8>}, {pipeline_mode = #tpu.pipeline_mode<synchronous>, transform_indices = @transform_2, window_bounds = array<i64: 32, 16>}, {pipeline_mode = #tpu.pipeline_mode<synchronous>, transform_indices = @transform_3, window_bounds = array<i64: 16, 1>}, {pipeline_mode = #tpu.pipeline_mode<synchronous>, transform_indices = @transform_4, window_bounds = array<i64: 32, 1>}, {transform_indices = @transform_5, window_bounds = array<i64: 1, 32, 16>}]} {
    %c0 = arith.constant 0 : index
    %c0_0 = arith.constant 0 : index
    %c0_1 = arith.constant 0 : index
    %c0_2 = arith.constant 0 : index
    %0 = vector.load %arg2[%c0, %c0_0, %c0_1, %c0_2] : memref<1x1x8x128xbf16, #tpu.memory_space<vmem>>, vector<1x1x8x128xbf16>
    %1 = vector.shape_cast %0 : vector<1x1x8x128xbf16> to vector<8x128xbf16>
    %c0_3 = arith.constant 0 : index
    %c0_4 = arith.constant 0 : index
    %2 = vector.load %arg3[%c0_3, %c0_4] : memref<16x8xbf16, #tpu.memory_space<vmem>>, vector<16x8xbf16>
    %c0_5 = arith.constant 0 : index
    %c0_6 = arith.constant 0 : index
    %3 = vector.load %arg5[%c0_5, %c0_6] : memref<16x1xf32, #tpu.memory_space<vmem>>, vector<16x1xf32>
    %cst = arith.constant dense<0.000000e+00> : vector<16x128xf32>
    %4 = tpu.matmul %2, %1, %cst {dimension_numbers = #tpu.dot_dimension_numbers<[1], [0], [0], [1], [0, 0, 1, 1], [], []>} : vector<16x8xbf16>, vector<8x128xbf16>, vector<16x128xf32> -> vector<16x128xf32>
    %5 = vector.broadcast %3 : vector<16x1xf32> to vector<16x128xf32>
    %6 = arith.addf %4, %5 : vector<16x128xf32>
    %cst_7 = arith.constant 0.000000e+00 : f32
    %7 = vector.broadcast %cst_7 : f32 to vector<16x128xf32>
    %8 = arith.maximumf %6, %7 : vector<16x128xf32>
    %c0_8 = arith.constant 0 : index
    %c0_9 = arith.constant 0 : index
    %9 = vector.load %arg4[%c0_8, %c0_9] : memref<32x16xbf16, #tpu.memory_space<vmem>>, vector<32x16xbf16>
    %c0_10 = arith.constant 0 : index
    %c0_11 = arith.constant 0 : index
    %10 = vector.load %arg6[%c0_10, %c0_11] : memref<32x1xf32, #tpu.memory_space<vmem>>, vector<32x1xf32>
    %11 = arith.truncf %8 : vector<16x128xf32> to vector<16x128xbf16>
    %cst_12 = arith.constant dense<0.000000e+00> : vector<32x128xf32>
    %12 = tpu.matmul %9, %11, %cst_12 {dimension_numbers = #tpu.dot_dimension_numbers<[1], [0], [0], [1], [0, 0, 1, 1], [], []>} : vector<32x16xbf16>, vector<16x128xbf16>, vector<32x128xf32> -> vector<32x128xf32>
    %13 = vector.broadcast %10 : vector<32x1xf32> to vector<32x128xf32>
    %14 = arith.addf %12, %13 : vector<32x128xf32>
    %cst_13 = arith.constant 0.000000e+00 : f32
    %15 = vector.broadcast %cst_13 : f32 to vector<32x128xf32>
    %16 = arith.maximumf %14, %15 : vector<32x128xf32>
    %17 = vector.extract_strided_slice %16 {offsets = [0, 0], sizes = [32, 16], strides = [1, 1]} : vector<32x128xf32> to vector<32x16xf32>
    %18 = vector.extract_strided_slice %16 {offsets = [0, 16], sizes = [32, 16], strides = [1, 1]} : vector<32x128xf32> to vector<32x16xf32>
    %19 = arith.maximumf %17, %18 : vector<32x16xf32>
    %20 = vector.extract_strided_slice %16 {offsets = [0, 32], sizes = [32, 16], strides = [1, 1]} : vector<32x128xf32> to vector<32x16xf32>
    %21 = arith.maximumf %19, %20 : vector<32x16xf32>
    %22 = vector.extract_strided_slice %16 {offsets = [0, 48], sizes = [32, 16], strides = [1, 1]} : vector<32x128xf32> to vector<32x16xf32>
    %23 = arith.maximumf %21, %22 : vector<32x16xf32>
    %24 = vector.extract_strided_slice %16 {offsets = [0, 64], sizes = [32, 16], strides = [1, 1]} : vector<32x128xf32> to vector<32x16xf32>
    %25 = arith.maximumf %23, %24 : vector<32x16xf32>
    %26 = vector.extract_strided_slice %16 {offsets = [0, 80], sizes = [32, 16], strides = [1, 1]} : vector<32x128xf32> to vector<32x16xf32>
    %27 = arith.maximumf %25, %26 : vector<32x16xf32>
    %28 = vector.extract_strided_slice %16 {offsets = [0, 96], sizes = [32, 16], strides = [1, 1]} : vector<32x128xf32> to vector<32x16xf32>
    %29 = arith.maximumf %27, %28 : vector<32x16xf32>
    %30 = vector.extract_strided_slice %16 {offsets = [0, 112], sizes = [32, 16], strides = [1, 1]} : vector<32x128xf32> to vector<32x16xf32>
    %31 = arith.maximumf %29, %30 : vector<32x16xf32>
    %c0_14 = arith.constant 0 : index
    %c0_15 = arith.constant 0 : index
    %c0_16 = arith.constant 0 : index
    %32 = vector.load %arg7[%c0_14, %c0_15, %c0_16] : memref<1x32x16xf32, #tpu.memory_space<vmem>>, vector<1x32x16xf32>
    %33 = vector.shape_cast %32 : vector<1x32x16xf32> to vector<32x16xf32>
    %34 = vector.shape_cast %31 : vector<32x16xf32> to vector<1x32x16xf32>
    tpu.vector_store %arg7[%c0_14, %c0_15, %c0_16], %34 {strides = array<i32>} : memref<1x32x16xf32, #tpu.memory_space<vmem>>, vector<1x32x16xf32>,
    return
  }
  func.func @transform_0(%arg0: i32, %arg1: i32) -> (i32, i32, i32, i32) {
    %c0_i32 = arith.constant 0 : i32
    %c0_i32_0 = arith.constant 0 : i32
    %c0_i32_1 = arith.constant 0 : i32
    return %arg0, %arg1, %c0_i32, %c0_i32_0 : i32, i32, i32, i32
  }
  func.func @transform_1(%arg0: i32, %arg1: i32) -> (i32, i32) {
    %c0_i32 = arith.constant 0 : i32
    %c0_i32_0 = arith.constant 0 : i32
    %c0_i32_1 = arith.constant 0 : i32
    return %c0_i32, %c0_i32_0 : i32, i32
  }
  func.func @transform_2(%arg0: i32, %arg1: i32) -> (i32, i32) {
    %c0_i32 = arith.constant 0 : i32
    %c0_i32_0 = arith.constant 0 : i32
    %c0_i32_1 = arith.constant 0 : i32
    return %c0_i32, %c0_i32_0 : i32, i32
  }
  func.func @transform_3(%arg0: i32, %arg1: i32) -> (i32, i32) {
    %c0_i32 = arith.constant 0 : i32
    %c0_i32_0 = arith.constant 0 : i32
    %c0_i32_1 = arith.constant 0 : i32
    return %c0_i32, %c0_i32_0 : i32, i32
  }
  func.func @transform_4(%arg0: i32, %arg1: i32) -> (i32, i32) {
    %c0_i32 = arith.constant 0 : i32
    %c0_i32_0 = arith.constant 0 : i32
    %c0_i32_1 = arith.constant 0 : i32
    return %c0_i32, %c0_i32_0 : i32, i32
  }
  func.func @transform_5(%arg0: i32, %arg1: i32) -> (i32, i32, i32) {
    %c0_i32 = arith.constant 0 : i32
    %c0_i32_0 = arith.constant 0 : i32
    return %arg0, %c0_i32, %arg1 : i32, i32, i32
  }
}

</mosaic_0001>

<bundles_post_ra>
// kernel: tpu_custom_call.1
= control target key start
LH: loop header
LB: loop body
LE: loop exit
PB: predicated region body
PF: predicated region fallthrough
CT: control target
= control target key end

     0   :  { %s694_s18 = smov 0   ;;  %s696_s19 = smov 0   ;;  %s804_s0 = inlined_call_operand.vmem [shape: bf16[2,1,8,128], index: 0, kind: input, shape index: {}]   ;;  %s805_s1 = inlined_call_operand.vmem [shape: bf16[16,8], index: 1, kind: input, shape index: {}]   ;;  %s806_s2 = inlined_call_operand.vmem [shape: bf16[32,16], index: 2, kind: input, shape index: {}]   ;;  %s807_s3 = inlined_call_operand.vmem [shape: f32[16,1], index: 3, kind: input, shape index: {}]   ;;  %s808_s4 = inlined_call_operand.vmem [shape: f32[32,1], index: 4, kind: input, shape index: {}]   ;;  %s809_s5 = inlined_call_operand.vmem [shape: f32[2,32,16], index: 5, kind: output, shape index: {}]  }
   0x1   :  { %s698_s20 = smov 0  }
   0x2 LB: > { %s27_s21 = sadd.s32 1, %s650_s19  ;;  %p571_p0 = scmp.ge.s32.totalorder %s654_s20, 1  ;;  %s654_s20 = sphi %s698_s20, %s15_s20   ;;  %s650_s19 = sphi %s696_s19, %s811_s19   ;;  %s646_s18 = sphi %s694_s18, %s810_s18  }
   0x3   : > { %p29_p1 = scmp.ge.s32.totalorder %s27_s21, 2  ;;  %p205_p2 = scmp.lt.s32.totalorder %s654_s20, 3 }
   0x5   : > { %s813_s21 = smov (%p29_p1, %s27_s21), 0  ;;  %p206_p3 = pnand %p571_p0, %p205_p2 }
   0x6   : > { %p238_p4 = scmp.lt.s32.totalorder (!%p206_p3), %s646_s18, 1  ;;  %s657_s23 = smov (!%p206_p3), 80  }
   0x7   : > { %209 = sbr.rel (%p206_p3) target bundleno = 484 (0x1e4), region = 40  ;;  %s659_s25 = smov (!%p206_p3), 112  }
   0x8   : > { %s660_s26 = smov (!%p206_p3), 32   ;;  %s662_s28 = smov (!%p206_p3), 64  }
   0x9   : > { %s663_s29 = smov (!%p206_p3), 16  }
   0xc   : > { %v257_v0 = vld [vmem:[%s807_s3] sm:$0xff]  ;;  %v656_v1 = vmov 0   ;;  %s815_s18 = smov (!%p238_p4, %s646_s18), 1  ;;  %vm278_vm0 = vcmask 1043456   ;;  %v258_v5 = vld [vmem:[%s807_s3 + $0x8] sm:$0xff]  ;;  %vm274_vm1 = vcmask 64512  }
   0xd   : > { %629 = vset.pattern.permute.xlu0 %v656_v1  ;;  %630 = vset.pattern.permute.xlu1 %v656_v1  ;;  %s572_s24 = sshll.u32 %s815_s18, 2  ;;  %v593_v4 = vld [vmem:[%s805_s1] sm:$0xff]  ;;  %v304_v7 = vld [vmem:[%s808_s4 + $0x10] sm:$0xff]  ;;  %v303_v8 = vld [vmem:[%s808_s4 + $0x8] sm:$0xff]  ;;  %vm337_vm2 = vcmask 130048   ;;  %s592_s30 = sshll.u32 %s815_s18, 5 }
   0xe   : > { %261 = vperm.xlu0 %629, %v257_v0   ;;  %631 = vset.pattern.permute.xlu2 %v656_v1  ;;  %s244_s27 = scalar_lea.vmem %s804_s0, %s572_s24  ;;  %v302_v6 = vld [vmem:[%s808_s4] sm:$0xff]  ;;  %v305_v9 = vld [vmem:[%s808_s4 + $0x18] sm:$0xff]  ;;  %v595_v20 = vld [vmem:[%s806_s2 + $0x8] sm:$0xff]  ;;  %s658_s24 = smov 96  }
   0xf   : > { %v254_v2 = vld [vmem:[%s244_s27] sm:$0xf]  ;;  %309 = vperm.xlu1 %630, %v302_v6   ;;  %319 = vperm.xlu2 %631, %v304_v7   ;;  %s661_s27 = smov 48   ;;  %s784_s8 = scalar_lea.vmem %s809_s5, %s592_s30 }
  0x10   : > { %v280_v3 = vsel %vm278_vm0, %v254_v2, 0  ;;  %v594_v19 = vld [vmem:[%s806_s2] sm:$0xff] }
  0x11   : > { %289 = vmatpush.bf16.msra.mxu0 %v280_v3 }
  0x14   : > { %579 = vmatmul.msk.bf16.vlgmr.msra.gmra.mxu0 %vm274_vm1, %v593_v4 }
  0x16   : > { %266 = vperm.xlu0 %629, %v258_v5  }
  0x17   : > { %314 = vperm.xlu1 %630, %v303_v8   ;;  %324 = vperm.xlu2 %631, %v305_v9  }
  0x69   : > { %v320_v25 = vpop.permute.xlu2 %319 }
  0x71   : > { %v325_v33 = vpop.permute.xlu2 %324 }
  0x80   : > { %v262_v10 = vpop.permute.xlu0 %261 }
  0x81   : > { %v310_v21 = vpop.permute.xlu1 %309 }
  0x88   : > { %v267_v13 = vpop.permute.xlu0 %266 }
  0x89   : > { %v315_v30 = vpop.permute.xlu1 %314 }
  0x91   : > { %v291_v11 = vpop.f32.mrf.mxu0 }
  0x92   : > { %v292_v12 = vadd.f32 %v291_v11, %v262_v10 }
  0x94   : > { %v296_v16 = vmax.f32 %v292_v12, 0.0 }
  0x99   : > { %v293_v14 = vpop.f32.mrf.mxu0 }
  0x9a   : > { %v294_v15 = vadd.f32 %v293_v14, %v267_v13 }
  0x9c   : > { %v297_v17 = vmax.f32 %v294_v15, 0.0 }
  0x9e   : > { %v306_v18 = vpack.c.bf16 %v297_v17, %v296_v16 }
  0xa0   : > { %351 = vmatpush.bf16.msra.mxu1 %v306_v18  ;;  %596 = vmatpush.bf16.msra.mxu2 %v306_v18 }
  0xa3   : > { %588 = vmatmul.msk.bf16.vlgmr.msra.gmra.mxu1 %vm337_vm2, %v594_v19  ;;  %589 = vmatmul.msk.bf16.vlgmr.msra.gmra.mxu2 %vm337_vm2, %v595_v20 }
 0x120   : > { %v353_v22 = vpop.f32.mrf.mxu1 }
 0x121   : > { %v354_v23 = vadd.f32 %v353_v22, %v310_v21 }
 0x123   : > { %v363_v24 = vmax.f32 %v354_v23, 0.0 }
 0x125   : > { %403 = vrot.lane.b32.xlu2 %v363_v24, %s657_s23  ;;  %387 = vrot.lane.b32.xlu1 %v363_v24, %s658_s24 }
 0x126   : > { %371 = vrot.lane.b32.xlu0 %v363_v24, %s659_s25  ;;  %v358_v26 = vpop.f32.mrf.mxu2 }
 0x127   : > { %v359_v27 = vadd.f32 %v358_v26, %v320_v25 }
 0x128   : > { %v355_v29 = vpop.f32.mrf.mxu1 }
 0x129   : > { %v365_v28 = vmax.f32 %v359_v27, 0.0  ;;  %v356_v31 = vadd.f32 %v355_v29, %v315_v30 }
 0x12b   : > { %v758_v32 = vmax.f32 %v356_v31, 0.0 }
 0x12d   : > { %451 = vrot.lane.b32.xlu2 %v363_v24, %s660_s26  ;;  %435 = vrot.lane.b32.xlu1 %v363_v24, %s661_s27 }
 0x12e   : > { %419 = vrot.lane.b32.xlu0 %v363_v24, %s662_s28  ;;  %v360_v34 = vpop.f32.mrf.mxu2 }
 0x12f   : > { %v361_v35 = vadd.f32 %v360_v34, %v325_v33 }
 0x131   : > { %v366_v36 = vmax.f32 %v361_v35, 0.0 }
 0x135   : > { %375 = vrot.lane.b32.xlu2 %v365_v28, %s659_s25  ;;  %407 = vrot.lane.b32.xlu1 %v365_v28, %s657_s23 }
 0x136   : > { %467 = vrot.lane.b32.xlu0 %v363_v24, %s663_s29 }
 0x13d   : > { %423 = vrot.lane.b32.xlu2 %v365_v28, %s662_s28  ;;  %455 = vrot.lane.b32.xlu1 %v365_v28, %s660_s26 }
 0x13e   : > { %391 = vrot.lane.b32.xlu0 %v365_v28, %s658_s24 }
 0x145   : > { %389 = vrot.lane.b32.xlu2 %v758_v32, %s658_s24  ;;  %373 = vrot.lane.b32.xlu1 %v758_v32, %s659_s25 }
 0x146   : > { %439 = vrot.lane.b32.xlu0 %v365_v28, %s661_s27 }
 0x14d   : > { %437 = vrot.lane.b32.xlu2 %v758_v32, %s661_s27  ;;  %421 = vrot.lane.b32.xlu1 %v758_v32, %s662_s28 }
 0x14e   : > { %405 = vrot.lane.b32.xlu0 %v758_v32, %s657_s23 }
 0x155   : > { %409 = vrot.lane.b32.xlu2 %v366_v36, %s657_s23  ;;  %393 = vrot.lane.b32.xlu1 %v366_v36, %s658_s24 }
 0x156   : > { %453 = vrot.lane.b32.xlu0 %v758_v32, %s660_s26 }
 0x15d   : > { %457 = vrot.lane.b32.xlu2 %v366_v36, %s660_s26  ;;  %441 = vrot.lane.b32.xlu1 %v366_v36, %s661_s27 }
 0x15e   : > { %377 = vrot.lane.b32.xlu0 %v366_v36, %s659_s25 }
 0x165   : > { %471 = vrot.lane.b32.xlu2 %v365_v28, %s663_s29  ;;  %469 = vrot.lane.b32.xlu1 %v758_v32, %s663_s29 }
 0x166   : > { %425 = vrot.lane.b32.xlu0 %v366_v36, %s662_s28 }
 0x16e   : > { %473 = vrot.lane.b32.xlu0 %v366_v36, %s663_s29 }
 0x17f   : > { %v404_v37 = vpop.permute.xlu2 %403 }
 0x187   : > { %v452_v38 = vpop.permute.xlu2 %451 }
 0x18f   : > { %v376_v39 = vpop.permute.xlu2 %375 }
 0x190   : > { %v385_v56 = vmax.f32 %v365_v28, %v376_v39 }
 0x197   : > { %v424_v40 = vpop.permute.xlu2 %423  ;;  %v388_v41 = vpop.permute.xlu1 %387 }
 0x198   : > { %v372_v42 = vpop.permute.xlu0 %371 }
 0x199   : > { %v383_v43 = vmax.f32 %v363_v24, %v372_v42 }
 0x19b   : > { %v399_v44 = vmax.f32 %v383_v43, %v388_v41 }
 0x19d   : > { %v415_v47 = vmax.f32 %v399_v44, %v404_v37 }
 0x19f   : > { %v390_v45 = vpop.permute.xlu2 %389  ;;  %v436_v46 = vpop.permute.xlu1 %435 }
 0x1a0   : > { %v420_v48 = vpop.permute.xlu0 %419 }
 0x1a1   : > { %v431_v49 = vmax.f32 %v415_v47, %v420_v48 }
 0x1a3   : > { %v447_v50 = vmax.f32 %v431_v49, %v436_v46 }
 0x1a5   : > { %v463_v53 = vmax.f32 %v447_v50, %v452_v38 }
 0x1a7   : > { %v438_v51 = vpop.permute.xlu2 %437  ;;  %v408_v52 = vpop.permute.xlu1 %407 }
 0x1a8   : > { %v468_v54 = vpop.permute.xlu0 %467 }
 0x1a9   : > { %v479_v55 = vmax.f32 %v463_v53, %v468_v54 }
 0x1ab   : > { %483 = vst.msk [vmem:[%s784_s8] sm:$0xff] %vm337_vm2, %v479_v55 }
 0x1af   : > { %v410_v57 = vpop.permute.xlu2 %409  ;;  %v456_v58 = vpop.permute.xlu1 %455 }
 0x1b0   : > { %v392_v59 = vpop.permute.xlu0 %391 }
 0x1b1   : > { %v401_v60 = vmax.f32 %v385_v56, %v392_v59 }
 0x1b3   : > { %v417_v61 = vmax.f32 %v401_v60, %v408_v52 }
 0x1b5   : > { %v433_v0 = vmax.f32 %v417_v61, %v424_v40 }
 0x1b7   : > { %v458_v62 = vpop.permute.xlu2 %457  ;;  %v374_v63 = vpop.permute.xlu1 %373 }
 0x1b8   : > { %v440_v1 = vpop.permute.xlu0 %439  ;;  %v384_v8 = vmax.f32 %v758_v32, %v374_v63 }
 0x1b9   : > { %v449_v2 = vmax.f32 %v433_v0, %v440_v1 }
 0x1ba   : > { %v400_v11 = vmax.f32 %v384_v8, %v390_v45 }
 0x1bb   : > { %v465_v3 = vmax.f32 %v449_v2, %v456_v58 }
 0x1bf   : > { %v472_v4 = vpop.permute.xlu2 %471  ;;  %v422_v5 = vpop.permute.xlu1 %421 }
 0x1c0   : > { %v481_v6 = vmax.f32 %v465_v3, %v472_v4  ;;  %v406_v7 = vpop.permute.xlu0 %405 }
 0x1c1   : > { %v416_v12 = vmax.f32 %v400_v11, %v406_v7 }
 0x1c2   : > { %485 = vst.msk [vmem:[%s784_s8 + $0x10] sm:$0xff] %vm337_vm2, %v481_v6 }
 0x1c3   : > { %v432_v14 = vmax.f32 %v416_v12, %v422_v5 }
 0x1c5   : > { %v448_v18 = vmax.f32 %v432_v14, %v438_v51 }
 0x1c7   : > { %v394_v9 = vpop.permute.xlu1 %393 }
 0x1c8   : > { %v454_v10 = vpop.permute.xlu0 %453 }
 0x1c9   : > { %v464_v19 = vmax.f32 %v448_v18, %v454_v10 }
 0x1cf   : > { %v442_v13 = vpop.permute.xlu1 %441 }
 0x1d0   : > { %v378_v15 = vpop.permute.xlu0 %377 }
 0x1d1   : > { %v386_v16 = vmax.f32 %v366_v36, %v378_v15 }
 0x1d3   : > { %v402_v17 = vmax.f32 %v386_v16, %v394_v9 }
 0x1d5   : > { %v418_v21 = vmax.f32 %v402_v17, %v410_v57 }
 0x1d7   : > { %v470_v20 = vpop.permute.xlu1 %469 }
 0x1d8   : > { %v480_v22 = vmax.f32 %v464_v19, %v470_v20  ;;  %v426_v23 = vpop.permute.xlu0 %425 }
 0x1d9   : > { %v434_v24 = vmax.f32 %v418_v21, %v426_v23 }
 0x1da   : > { %484 = vst.msk [vmem:[%s784_s8 + $0x8] sm:$0xff] %vm337_vm2, %v480_v22 }
 0x1db   : > { %v450_v25 = vmax.f32 %v434_v24, %v442_v13 }
 0x1dd   : > { %v466_v26 = vmax.f32 %v450_v25, %v458_v62 }
 0x1e0   : > { %v474_v27 = vpop.permute.xlu0 %473 }
 0x1e1   : > { %v482_v28 = vmax.f32 %v466_v26, %v474_v27 }
 0x1e3   : > { %486 = vst.msk [vmem:[%s784_s8 + $0x18] sm:$0xff] %vm337_vm2, %v482_v28 }
 0x1e4 PF: > { %s15_s20 = sadd.s32 1, %s654_s20   ;;  %s810_s18 = smov %s650_s19 }
 0x1e5   : > { %p12_p5 = scmp.ge.s32.totalorder %s15_s20, 4   ;;  %s811_s19 = smov %s813_s21 }
 0x1e7   :  { %14 = sbr.rel (!%p12_p5) target bundleno = 2 (0x2), region = 70 }

</bundles_post_ra>
